<compile_context>
chip_gen: v6e
topology: v6e:2x2x1
jax: 0.10.0
libtpu: 0.0.40
codegen_flags: <defaults>
</compile_context>

<pallas_src>
import jax
import jax.numpy as jnp
from jax.experimental import pallas as pl
from jax.experimental.pallas import tpu as pltpu


def _make_kernel(*, G, hd, HG, has_qkv_bias, weights_resident):
    """Build the per-(batch, head-group) kernel body."""

    def kernel(*refs):
        if has_qkv_bias:
            x_ref, wqkv_ref, bqkv_ref, wo_ref, bo_ref, o_ref, ctx_ref = refs
        else:
            x_ref, wqkv_ref, wo_ref, bo_ref, o_ref, ctx_ref = refs
            bqkv_ref = None

        hg = pl.program_id(1)
        # Resident weights carry all head groups -> index by hg; streamed
        # weights arrive as a single-group tile -> index 0.
        widx = hg if (weights_resident and HG > 1) else 0

        x = x_ref[...]                                        # [S, D]  bf16

        # Fused Q/K/V projection for this group's G heads: ONE MXU pass with
        # N = 3*G*hd.  Softmax scale is already folded into the Q columns.
        qkv = jnp.dot(x, wqkv_ref[widx],
                      preferred_element_type=jnp.float32)     # [S, 3*G*hd]
        if bqkv_ref is not None:
            qkv = qkv + bqkv_ref[widx]                        # [1, 3*G*hd]

        ctx_parts = []
        for g in range(G):                                    # static unroll
            q = qkv[:, g * hd:(g + 1) * hd].astype(jnp.bfloat16)
            k = qkv[:, (G + g) * hd:(G + g + 1) * hd].astype(jnp.bfloat16)
            v = qkv[:, (2 * G + g) * hd:(2 * G + g + 1) * hd].astype(jnp.bfloat16)

            # Scores: contract head_dim of q and k directly (no k transpose).
            s = jax.lax.dot_general(
                q, k, dimension_numbers=(((1,), (1,)), ((), ())),
                preferred_element_type=jnp.float32)           # [S, S]

            # Stable softmax with DEFERRED normalization: keep p unnormalized
            # and rescale the much smaller [S, hd] context instead of the
            # [S, S] probabilities (EUP approx reciprocal for the divide).
            m = jnp.max(s, axis=-1, keepdims=True)
            p = jnp.exp(s - m)                                # f32
            denom = jnp.sum(p, axis=-1, keepdims=True)        # [S, 1]
            ctx = jnp.dot(p.astype(jnp.bfloat16), v,
                          preferred_element_type=jnp.float32)  # [S, hd]
            ctx = ctx * pl.reciprocal(denom, approx=True)
            ctx_parts.append(ctx.astype(ctx_ref.dtype))

        # Stage this group's context into the persistent [S, D] slab.  Every
        # column is written before the epilogue reads it -> no zero-init and
        # no f32 accumulator read-modify-write.
        if HG == 1:
            for g in range(G):                                # static offsets
                ctx_ref[:, g * hd:(g + 1) * hd] = ctx_parts[g]
        else:
            ctx_group = (ctx_parts[0] if G == 1
                         else jnp.concatenate(ctx_parts, axis=1))  # [S, G*hd]
            col0 = pl.multiple_of(hg * (G * hd), G * hd)
            ctx_ref[:, pl.ds(col0, G * hd)] = ctx_group

        # After the last head group: ONE output projection with contraction
        # K = D (full-depth MXU pass) + proj bias, written to the out tile.
        @pl.when(hg == pl.num_programs(1) - 1)
        def _():
            out = jnp.dot(ctx_ref[...], wo_ref[...],
                          preferred_element_type=jnp.float32) + bo_ref[...]
            o_ref[...] = out.astype(o_ref.dtype)

    return kernel


def intern_attention(hidden_states, cu_seqlens, w_qkv, b_qkv, w_o, b_o,
                     *, num_heads):
    """Pallas wrapper.

    hidden_states: [B, S, D]
    w_qkv: [D, 3D]   (x @ w_qkv layout, i.e. PyTorch weight transposed)
    b_qkv: [1, 3D] or None (module default qkv_bias=False -> None)
    w_o:   [D, D]
    b_o:   [1, D]
    cu_seqlens is accepted for API parity; with flatten_batch=False each
    batch row is one full sequence, so it does not change the attention.
    """
    del cu_seqlens  # full (non-causal) attention per batch row
    B, S, D = hidden_states.shape
    H = num_heads
    hd = D // H
    scale = hd ** -0.5

    # Head grouping: process G heads per grid step so the fused QKV tile and
    # the ctx slab column write are lane-dense (G*hd >= 128 when possible).
    if hd >= 128:
        G = 1
    else:
        G = max(1, min(H, 128 // hd))
        while H % G:
            G -= 1
    HG = H // G

    # ---- wrapper-side weight re-layout (one-time, outside the kernel) ----
    wq, wk, wv = jnp.split(w_qkv, 3, axis=1)                  # each [D, D]

    def grouped(w):                                           # [D,D]->[HG,D,G*hd]
        return w.reshape(D, HG, G * hd).transpose(1, 0, 2)

    wqkv = jnp.concatenate(
        [grouped(wq) * scale, grouped(wk), grouped(wv)], axis=2
    ).astype(jnp.bfloat16)                                    # [HG, D, 3*G*hd]

    has_qkv_bias = b_qkv is not None
    if has_qkv_bias:
        bq, bk, bv = jnp.split(b_qkv.reshape(-1), 3)          # each [D]
        bqkv = jnp.concatenate(
            [(bq * scale).reshape(HG, 1, G * hd),
             bk.reshape(HG, 1, G * hd),
             bv.reshape(HG, 1, G * hd)], axis=2
        ).astype(jnp.float32)                                 # [HG, 1, 3*G*hd]

    wo = w_o.astype(jnp.bfloat16)                             # [D, D] resident
    bo = b_o.reshape(1, D).astype(jnp.float32)
    x = hidden_states.astype(jnp.bfloat16)

    # ---- generation-aware VMEM planning ----
    try:
        vmem_cap = int(pltpu.get_tpu_info().vmem_capacity_bytes)
    except Exception:  # pragma: no cover - conservative fallback
        vmem_cap = 64 * 1024 * 1024

    wqkv_bytes = int(wqkv.size) * 2
    # Keep projection weights resident (constant index_map -> fetched once)
    # whenever they comfortably fit; otherwise stream one head-group tile.
    weights_resident = (wqkv_bytes + D * D * 2) <= vmem_cap // 3

    out_itemsize = jnp.dtype(hidden_states.dtype).itemsize
    step_w_bytes = (wqkv_bytes if weights_resident
                    else 2 * (D * 3 * G * hd) * 2)            # double-buffered
    ws = (2 * S * D * 2                                       # x tile (bf16, 2-buf)
          + step_w_bytes
          + D * D * 2 + D * 4                                 # resident Wo + bo
          + S * (3 * G * hd) * 4                              # fused qkv (f32)
          + S * S * 6                                         # scores f32 + p bf16
          + S * D * 2                                         # ctx slab (bf16)
          + 2 * S * D * out_itemsize)                         # out tile (2-buf)
    vmem_limit = int(min(max(ws * 5 // 4, 32 * 1024 * 1024),
                         vmem_cap * 3 // 4))

    # ---- BlockSpecs ----
    if weights_resident:
        wqkv_spec = pl.BlockSpec((HG, D, 3 * G * hd), lambda b, hg: (0, 0, 0))
        bqkv_spec = pl.BlockSpec((HG, 1, 3 * G * hd), lambda b, hg: (0, 0, 0))
    else:
        wqkv_spec = pl.BlockSpec((1, D, 3 * G * hd), lambda b, hg: (hg, 0, 0))
        bqkv_spec = pl.BlockSpec((1, 1, 3 * G * hd), lambda b, hg: (hg, 0, 0))

    in_specs = [pl.BlockSpec((None, S, D), lambda b, hg: (b, 0, 0)),   # x
                wqkv_spec]                                              # W_qkv
    args = [x, wqkv]
    if has_qkv_bias:
        in_specs.append(bqkv_spec)                                      # b_qkv
        args.append(bqkv)
    in_specs += [pl.BlockSpec((D, D), lambda b, hg: (0, 0)),            # W_o
                 pl.BlockSpec((1, D), lambda b, hg: (0, 0))]            # b_o
    args += [wo, bo]

    kernel = _make_kernel(G=G, hd=hd, HG=HG,
                          has_qkv_bias=has_qkv_bias,
                          weights_resident=weights_resident)

    return pl.pallas_call(
        kernel,
        out_shape=jax.ShapeDtypeStruct((B, S, D), hidden_states.dtype),
        grid=(B, HG),
        in_specs=in_specs,
        out_specs=pl.BlockSpec((None, S, D), lambda b, hg: (b, 0, 0)),
        scratch_shapes=[pltpu.VMEM((S, D), jnp.bfloat16)],   # ctx staging slab
        compiler_params=pltpu.CompilerParams(
            dimension_semantics=("parallel", "arbitrary"),
            vmem_limit_bytes=vmem_limit),
    )(*args)


def _reference(hidden_states, w_qkv, b_qkv, w_o, b_o, *, num_heads):
    """Pure-JAX f32 reference for correctness check."""
    B, S, D = hidden_states.shape
    hd = D // num_heads
    scale = hd ** -0.5
    bias = (jnp.zeros((3 * D,), hidden_states.dtype) if b_qkv is None
            else b_qkv.reshape(-1))
    qkv = hidden_states @ w_qkv + bias                        # [B, S, 3D]
    q, k, v = jnp.split(qkv, 3, axis=-1)

    def split_heads(t):
        return t.reshape(B, S, num_heads, hd).transpose(0, 2, 1, 3)

    q, k, v = split_heads(q), split_heads(k), split_heads(v)
    s = jnp.einsum('bhqd,bhkd->bhqk', q, k) * scale
    p = jax.nn.softmax(s, axis=-1)
    ctx = jnp.einsum('bhqk,bhkd->bhqd', p, v)
    ctx = ctx.transpose(0, 2, 1, 3).reshape(B, S, D)
    return ctx @ w_o + b_o.reshape(-1)


if __name__ == "__main__":
    # Small config consistent with the module: hidden_size=32, num_heads=4.
    B, S, D, H = 2, 8, 32, 4

    key = jax.random.PRNGKey(0)
    kx, kq, ko, kb, kqb = jax.random.split(key, 5)

    hidden_states = jax.random.normal(kx, (B, S, D), dtype=jnp.float32)
    w_qkv = jax.random.normal(kq, (D, 3 * D), dtype=jnp.float32) * 0.05
    w_o = jax.random.normal(ko, (D, D), dtype=jnp.float32) * 0.05
    b_o = jax.random.normal(kb, (1, D), dtype=jnp.float32) * 0.01

    # cu_seqlens as the module expects: cumulative sequence lengths.
    cu_seqlens = jnp.array([0, S, 2 * S], dtype=jnp.int32)

    # 1) Module default config: qkv_bias=False -> bias path compiled out.
    out = intern_attention(hidden_states, cu_seqlens, w_qkv, None, w_o, b_o,
                           num_heads=H)
    out = jax.block_until_ready(out)
    ref = _reference(hidden_states, w_qkv, None, w_o, b_o, num_heads=H)
    assert out.shape == (B, S, D)
    # bf16 MXU inputs + bf16 ctx staging + approx reciprocal -> modest tol.
    assert jnp.allclose(out.astype(jnp.float32), ref, atol=2e-2, rtol=2e-2), \
        "mismatch vs reference (no qkv bias)"

    # 2) qkv_bias=True config exercises the fused-bias path.
    b_qkv = jax.random.normal(kqb, (1, 3 * D), dtype=jnp.float32) * 0.02
    out_b = intern_attention(hidden_states, cu_seqlens, w_qkv, b_qkv, w_o, b_o,
                             num_heads=H)
    out_b = jax.block_until_ready(out_b)
    ref_b = _reference(hidden_states, w_qkv, b_qkv, w_o, b_o, num_heads=H)
    assert jnp.allclose(out_b.astype(jnp.float32), ref_b, atol=2e-2, rtol=2e-2), \
        "mismatch vs reference (with qkv bias)"

    print("KERNEL_OK")
</pallas_src>

<mosaic_0001>
module attributes {stable_mosaic.version = 11 : i64} {
  func.func @kernel(%arg0: i32, %arg1: i32, %arg2: memref<1x8x32xbf16, #tpu.memory_space<vmem>>, %arg3: memref<1x32x96xbf16, #tpu.memory_space<vmem>>, %arg4: memref<32x32xbf16, #tpu.memory_space<vmem>>, %arg5: memref<1x32xf32, #tpu.memory_space<vmem>>, %arg6: memref<1x8x32xf32, #tpu.memory_space<vmem>>, %arg7: memref<8x32xbf16, #tpu.memory_space<vmem>>) attributes {dimension_semantics = [#tpu.dimension_semantics<parallel>, #tpu.dimension_semantics<arbitrary>], iteration_bounds = array<i64: 2, 1>, scalar_prefetch = 0 : i64, scratch_operands = 1 : i64, tpu.core_type = #tpu.core_type<tc>, window_params = [{transform_indices = @transform_0, window_bounds = array<i64: 1, 8, 32>}, {pipeline_mode = #tpu.pipeline_mode<synchronous>, transform_indices = @transform_1, window_bounds = array<i64: 1, 32, 96>}, {pipeline_mode = #tpu.pipeline_mode<synchronous>, transform_indices = @transform_2, window_bounds = array<i64: 32, 32>}, {pipeline_mode = #tpu.pipeline_mode<synchronous>, transform_indices = @transform_3, window_bounds = array<i64: 1, 32>}, {transform_indices = @transform_4, window_bounds = array<i64: 1, 8, 32>}]} {
    %c0 = arith.constant 0 : index
    %c0_0 = arith.constant 0 : index
    %c0_1 = arith.constant 0 : index
    %0 = vector.load %arg2[%c0, %c0_0, %c0_1] : memref<1x8x32xbf16, #tpu.memory_space<vmem>>, vector<1x8x32xbf16>
    %1 = vector.shape_cast %0 : vector<1x8x32xbf16> to vector<8x32xbf16>
    %c0_2 = arith.constant 0 : index
    %c0_3 = arith.constant 0 : index
    %c0_4 = arith.constant 0 : index
    %2 = vector.load %arg3[%c0_2, %c0_3, %c0_4] : memref<1x32x96xbf16, #tpu.memory_space<vmem>>, vector<1x32x96xbf16>
    %3 = vector.shape_cast %2 : vector<1x32x96xbf16> to vector<32x96xbf16>
    %cst = arith.constant dense<0.000000e+00> : vector<8x96xf32>
    %4 = tpu.matmul %1, %3, %cst {dimension_numbers = #tpu.dot_dimension_numbers<[1], [0], [0], [1], [0, 0, 1, 1], [], []>} : vector<8x32xbf16>, vector<32x96xbf16>, vector<8x96xf32> -> vector<8x96xf32>
    %5 = vector.extract_strided_slice %4 {offsets = [0, 0], sizes = [8, 8], strides = [1, 1]} : vector<8x96xf32> to vector<8x8xf32>
    %6 = arith.truncf %5 : vector<8x8xf32> to vector<8x8xbf16>
    %7 = vector.extract_strided_slice %4 {offsets = [0, 32], sizes = [8, 8], strides = [1, 1]} : vector<8x96xf32> to vector<8x8xf32>
    %8 = arith.truncf %7 : vector<8x8xf32> to vector<8x8xbf16>
    %9 = vector.extract_strided_slice %4 {offsets = [0, 64], sizes = [8, 8], strides = [1, 1]} : vector<8x96xf32> to vector<8x8xf32>
    %10 = arith.truncf %9 : vector<8x8xf32> to vector<8x8xbf16>
    %cst_5 = arith.constant dense<0.000000e+00> : vector<8x8xf32>
    %11 = tpu.matmul %6, %8, %cst_5 {dimension_numbers = #tpu.dot_dimension_numbers<[1], [1], [0], [0], [0, 0, 1, 0], [], []>} : vector<8x8xbf16>, vector<8x8xbf16>, vector<8x8xf32> -> vector<8x8xf32>
    %cst_6 = arith.constant dense<0xFF800000> : vector<8xf32>
    %12 = vector.multi_reduction <maximumf>, %11, %cst_6 [1] : vector<8x8xf32> to vector<8xf32>
    %13 = vector.shape_cast %12 : vector<8xf32> to vector<8x1xf32>
    %14 = vector.broadcast %13 : vector<8x1xf32> to vector<8x8xf32>
    %15 = arith.subf %11, %14 : vector<8x8xf32>
    %16 = math.exp %15 : vector<8x8xf32>
    %cst_7 = arith.constant dense<0.000000e+00> : vector<8xf32>
    %17 = vector.multi_reduction <add>, %16, %cst_7 [1] : vector<8x8xf32> to vector<8xf32>
    %18 = vector.shape_cast %17 : vector<8xf32> to vector<8x1xf32>
    %19 = arith.truncf %16 : vector<8x8xf32> to vector<8x8xbf16>
    %cst_8 = arith.constant dense<0.000000e+00> : vector<8x8xf32>
    %20 = tpu.matmul %19, %10, %cst_8 {dimension_numbers = #tpu.dot_dimension_numbers<[1], [0], [0], [1], [0, 0, 1, 1], [], []>} : vector<8x8xbf16>, vector<8x8xbf16>, vector<8x8xf32> -> vector<8x8xf32>
    %21 = tpu.reciprocal %18 {approx = true} : vector<8x1xf32> -> vector<8x1xf32>
    %22 = vector.broadcast %21 : vector<8x1xf32> to vector<8x8xf32>
    %23 = arith.mulf %20, %22 : vector<8x8xf32>
    %24 = arith.truncf %23 : vector<8x8xf32> to vector<8x8xbf16>
    %25 = vector.extract_strided_slice %4 {offsets = [0, 8], sizes = [8, 8], strides = [1, 1]} : vector<8x96xf32> to vector<8x8xf32>
    %26 = arith.truncf %25 : vector<8x8xf32> to vector<8x8xbf16>
    %27 = vector.extract_strided_slice %4 {offsets = [0, 40], sizes = [8, 8], strides = [1, 1]} : vector<8x96xf32> to vector<8x8xf32>
    %28 = arith.truncf %27 : vector<8x8xf32> to vector<8x8xbf16>
    %29 = vector.extract_strided_slice %4 {offsets = [0, 72], sizes = [8, 8], strides = [1, 1]} : vector<8x96xf32> to vector<8x8xf32>
    %30 = arith.truncf %29 : vector<8x8xf32> to vector<8x8xbf16>
    %cst_9 = arith.constant dense<0.000000e+00> : vector<8x8xf32>
    %31 = tpu.matmul %26, %28, %cst_9 {dimension_numbers = #tpu.dot_dimension_numbers<[1], [1], [0], [0], [0, 0, 1, 0], [], []>} : vector<8x8xbf16>, vector<8x8xbf16>, vector<8x8xf32> -> vector<8x8xf32>
    %cst_10 = arith.constant dense<0xFF800000> : vector<8xf32>
    %32 = vector.multi_reduction <maximumf>, %31, %cst_10 [1] : vector<8x8xf32> to vector<8xf32>
    %33 = vector.shape_cast %32 : vector<8xf32> to vector<8x1xf32>
    %34 = vector.broadcast %33 : vector<8x1xf32> to vector<8x8xf32>
    %35 = arith.subf %31, %34 : vector<8x8xf32>
    %36 = math.exp %35 : vector<8x8xf32>
    %cst_11 = arith.constant dense<0.000000e+00> : vector<8xf32>
    %37 = vector.multi_reduction <add>, %36, %cst_11 [1] : vector<8x8xf32> to vector<8xf32>
    %38 = vector.shape_cast %37 : vector<8xf32> to vector<8x1xf32>
    %39 = arith.truncf %36 : vector<8x8xf32> to vector<8x8xbf16>
    %cst_12 = arith.constant dense<0.000000e+00> : vector<8x8xf32>
    %40 = tpu.matmul %39, %30, %cst_12 {dimension_numbers = #tpu.dot_dimension_numbers<[1], [0], [0], [1], [0, 0, 1, 1], [], []>} : vector<8x8xbf16>, vector<8x8xbf16>, vector<8x8xf32> -> vector<8x8xf32>
    %41 = tpu.reciprocal %38 {approx = true} : vector<8x1xf32> -> vector<8x1xf32>
    %42 = vector.broadcast %41 : vector<8x1xf32> to vector<8x8xf32>
    %43 = arith.mulf %40, %42 : vector<8x8xf32>
    %44 = arith.truncf %43 : vector<8x8xf32> to vector<8x8xbf16>
    %45 = vector.extract_strided_slice %4 {offsets = [0, 16], sizes = [8, 8], strides = [1, 1]} : vector<8x96xf32> to vector<8x8xf32>
    %46 = arith.truncf %45 : vector<8x8xf32> to vector<8x8xbf16>
    %47 = vector.extract_strided_slice %4 {offsets = [0, 48], sizes = [8, 8], strides = [1, 1]} : vector<8x96xf32> to vector<8x8xf32>
    %48 = arith.truncf %47 : vector<8x8xf32> to vector<8x8xbf16>
    %49 = vector.extract_strided_slice %4 {offsets = [0, 80], sizes = [8, 8], strides = [1, 1]} : vector<8x96xf32> to vector<8x8xf32>
    %50 = arith.truncf %49 : vector<8x8xf32> to vector<8x8xbf16>
    %cst_13 = arith.constant dense<0.000000e+00> : vector<8x8xf32>
    %51 = tpu.matmul %46, %48, %cst_13 {dimension_numbers = #tpu.dot_dimension_numbers<[1], [1], [0], [0], [0, 0, 1, 0], [], []>} : vector<8x8xbf16>, vector<8x8xbf16>, vector<8x8xf32> -> vector<8x8xf32>
    %cst_14 = arith.constant dense<0xFF800000> : vector<8xf32>
    %52 = vector.multi_reduction <maximumf>, %51, %cst_14 [1] : vector<8x8xf32> to vector<8xf32>
    %53 = vector.shape_cast %52 : vector<8xf32> to vector<8x1xf32>
    %54 = vector.broadcast %53 : vector<8x1xf32> to vector<8x8xf32>
    %55 = arith.subf %51, %54 : vector<8x8xf32>
    %56 = math.exp %55 : vector<8x8xf32>
    %cst_15 = arith.constant dense<0.000000e+00> : vector<8xf32>
    %57 = vector.multi_reduction <add>, %56, %cst_15 [1] : vector<8x8xf32> to vector<8xf32>
    %58 = vector.shape_cast %57 : vector<8xf32> to vector<8x1xf32>
    %59 = arith.truncf %56 : vector<8x8xf32> to vector<8x8xbf16>
    %cst_16 = arith.constant dense<0.000000e+00> : vector<8x8xf32>
    %60 = tpu.matmul %59, %50, %cst_16 {dimension_numbers = #tpu.dot_dimension_numbers<[1], [0], [0], [1], [0, 0, 1, 1], [], []>} : vector<8x8xbf16>, vector<8x8xbf16>, vector<8x8xf32> -> vector<8x8xf32>
    %61 = tpu.reciprocal %58 {approx = true} : vector<8x1xf32> -> vector<8x1xf32>
    %62 = vector.broadcast %61 : vector<8x1xf32> to vector<8x8xf32>
    %63 = arith.mulf %60, %62 : vector<8x8xf32>
    %64 = arith.truncf %63 : vector<8x8xf32> to vector<8x8xbf16>
    %65 = vector.extract_strided_slice %4 {offsets = [0, 24], sizes = [8, 8], strides = [1, 1]} : vector<8x96xf32> to vector<8x8xf32>
    %66 = arith.truncf %65 : vector<8x8xf32> to vector<8x8xbf16>
    %67 = vector.extract_strided_slice %4 {offsets = [0, 56], sizes = [8, 8], strides = [1, 1]} : vector<8x96xf32> to vector<8x8xf32>
    %68 = arith.truncf %67 : vector<8x8xf32> to vector<8x8xbf16>
    %69 = vector.extract_strided_slice %4 {offsets = [0, 88], sizes = [8, 8], strides = [1, 1]} : vector<8x96xf32> to vector<8x8xf32>
    %70 = arith.truncf %69 : vector<8x8xf32> to vector<8x8xbf16>
    %cst_17 = arith.constant dense<0.000000e+00> : vector<8x8xf32>
    %71 = tpu.matmul %66, %68, %cst_17 {dimension_numbers = #tpu.dot_dimension_numbers<[1], [1], [0], [0], [0, 0, 1, 0], [], []>} : vector<8x8xbf16>, vector<8x8xbf16>, vector<8x8xf32> -> vector<8x8xf32>
    %cst_18 = arith.constant dense<0xFF800000> : vector<8xf32>
    %72 = vector.multi_reduction <maximumf>, %71, %cst_18 [1] : vector<8x8xf32> to vector<8xf32>
    %73 = vector.shape_cast %72 : vector<8xf32> to vector<8x1xf32>
    %74 = vector.broadcast %73 : vector<8x1xf32> to vector<8x8xf32>
    %75 = arith.subf %71, %74 : vector<8x8xf32>
    %76 = math.exp %75 : vector<8x8xf32>
    %cst_19 = arith.constant dense<0.000000e+00> : vector<8xf32>
    %77 = vector.multi_reduction <add>, %76, %cst_19 [1] : vector<8x8xf32> to vector<8xf32>
    %78 = vector.shape_cast %77 : vector<8xf32> to vector<8x1xf32>
    %79 = arith.truncf %76 : vector<8x8xf32> to vector<8x8xbf16>
    %cst_20 = arith.constant dense<0.000000e+00> : vector<8x8xf32>
    %80 = tpu.matmul %79, %70, %cst_20 {dimension_numbers = #tpu.dot_dimension_numbers<[1], [0], [0], [1], [0, 0, 1, 1], [], []>} : vector<8x8xbf16>, vector<8x8xbf16>, vector<8x8xf32> -> vector<8x8xf32>
    %81 = tpu.reciprocal %78 {approx = true} : vector<8x1xf32> -> vector<8x1xf32>
    %82 = vector.broadcast %81 : vector<8x1xf32> to vector<8x8xf32>
    %83 = arith.mulf %80, %82 : vector<8x8xf32>
    %84 = arith.truncf %83 : vector<8x8xf32> to vector<8x8xbf16>
    %c0_21 = arith.constant 0 : index
    %c0_22 = arith.constant 0 : index
    %85 = vector.load %arg7[%c0_21, %c0_22] : memref<8x32xbf16, #tpu.memory_space<vmem>>, vector<8x8xbf16>
    tpu.vector_store %arg7[%c0_21, %c0_22], %24 {strides = array<i32>} : memref<8x32xbf16, #tpu.memory_space<vmem>>, vector<8x8xbf16>,
    %c0_23 = arith.constant 0 : index
    %c8 = arith.constant 8 : index
    %86 = vector.load %arg7[%c0_23, %c8] : memref<8x32xbf16, #tpu.memory_space<vmem>>, vector<8x8xbf16>
    tpu.vector_store %arg7[%c0_23, %c8], %44 {strides = array<i32>} : memref<8x32xbf16, #tpu.memory_space<vmem>>, vector<8x8xbf16>,
    %c0_24 = arith.constant 0 : index
    %c16 = arith.constant 16 : index
    %87 = vector.load %arg7[%c0_24, %c16] : memref<8x32xbf16, #tpu.memory_space<vmem>>, vector<8x8xbf16>
    tpu.vector_store %arg7[%c0_24, %c16], %64 {strides = array<i32>} : memref<8x32xbf16, #tpu.memory_space<vmem>>, vector<8x8xbf16>,
    %c0_25 = arith.constant 0 : index
    %c24 = arith.constant 24 : index
    %88 = vector.load %arg7[%c0_25, %c24] : memref<8x32xbf16, #tpu.memory_space<vmem>>, vector<8x8xbf16>
    tpu.vector_store %arg7[%c0_25, %c24], %84 {strides = array<i32>} : memref<8x32xbf16, #tpu.memory_space<vmem>>, vector<8x8xbf16>,
    %c0_i32 = arith.constant 0 : i32
    %89 = arith.cmpi eq, %arg1, %c0_i32 : i32
    %90 = arith.extui %89 : i1 to i32
    %c0_i32_26 = arith.constant 0 : i32
    %91 = arith.cmpi ne, %90, %c0_i32_26 : i32
    scf.if %91 {
      %c0_27 = arith.constant 0 : index
      %c0_28 = arith.constant 0 : index
      %92 = vector.load %arg7[%c0_27, %c0_28] : memref<8x32xbf16, #tpu.memory_space<vmem>>, vector<8x32xbf16>
      %c0_29 = arith.constant 0 : index
      %c0_30 = arith.constant 0 : index
      %93 = vector.load %arg4[%c0_29, %c0_30] : memref<32x32xbf16, #tpu.memory_space<vmem>>, vector<32x32xbf16>
      %cst_31 = arith.constant dense<0.000000e+00> : vector<8x32xf32>
      %94 = tpu.matmul %92, %93, %cst_31 {dimension_numbers = #tpu.dot_dimension_numbers<[1], [0], [0], [1], [0, 0, 1, 1], [], []>} : vector<8x32xbf16>, vector<32x32xbf16>, vector<8x32xf32> -> vector<8x32xf32>
      %c0_32 = arith.constant 0 : index
      %c0_33 = arith.constant 0 : index
      %95 = vector.load %arg5[%c0_32, %c0_33] : memref<1x32xf32, #tpu.memory_space<vmem>>, vector<1x32xf32>
      %96 = vector.broadcast %95 : vector<1x32xf32> to vector<8x32xf32>
      %97 = arith.addf %94, %96 : vector<8x32xf32>
      %c0_34 = arith.constant 0 : index
      %c0_35 = arith.constant 0 : index
      %c0_36 = arith.constant 0 : index
      %98 = vector.load %arg6[%c0_34, %c0_35, %c0_36] : memref<1x8x32xf32, #tpu.memory_space<vmem>>, vector<1x8x32xf32>
      %99 = vector.shape_cast %98 : vector<1x8x32xf32> to vector<8x32xf32>
      %100 = vector.shape_cast %97 : vector<8x32xf32> to vector<1x8x32xf32>
      tpu.vector_store %arg6[%c0_34, %c0_35, %c0_36], %100 {strides = array<i32>} : memref<1x8x32xf32, #tpu.memory_space<vmem>>, vector<1x8x32xf32>,
    } else {
    }
    return
  }
  func.func @transform_0(%arg0: i32, %arg1: i32) -> (i32, i32, i32) {
    %c0_i32 = arith.constant 0 : i32
    %c0_i32_0 = arith.constant 0 : i32
    %c0_i32_1 = arith.constant 0 : i32
    return %arg0, %c0_i32, %c0_i32_0 : i32, i32, i32
  }
  func.func @transform_1(%arg0: i32, %arg1: i32) -> (i32, i32, i32) {
    %c0_i32 = arith.constant 0 : i32
    %c0_i32_0 = arith.constant 0 : i32
    %c0_i32_1 = arith.constant 0 : i32
    %c0_i32_2 = arith.constant 0 : i32
    return %c0_i32, %c0_i32_0, %c0_i32_1 : i32, i32, i32
  }
  func.func @transform_2(%arg0: i32, %arg1: i32) -> (i32, i32) {
    %c0_i32 = arith.constant 0 : i32
    %c0_i32_0 = arith.constant 0 : i32
    %c0_i32_1 = arith.constant 0 : i32
    return %c0_i32, %c0_i32_0 : i32, i32
  }
  func.func @transform_3(%arg0: i32, %arg1: i32) -> (i32, i32) {
    %c0_i32 = arith.constant 0 : i32
    %c0_i32_0 = arith.constant 0 : i32
    %c0_i32_1 = arith.constant 0 : i32
    return %c0_i32, %c0_i32_0 : i32, i32
  }
  func.func @transform_4(%arg0: i32, %arg1: i32) -> (i32, i32, i32) {
    %c0_i32 = arith.constant 0 : i32
    %c0_i32_0 = arith.constant 0 : i32
    %c0_i32_1 = arith.constant 0 : i32
    return %arg0, %c0_i32, %c0_i32_0 : i32, i32, i32
  }
}

</mosaic_0001>

<bundles_post_ra>
// kernel: tpu_custom_call.1
= control target key start
LH: loop header
LB: loop body
LE: loop exit
PB: predicated region body
PF: predicated region fallthrough
CT: control target
= control target key end

     0   :  { %9 = vsyncpa [#allocation4], 0  ;;  %s1692_s0 = inlined_call_operand.hbm [shape: bf16[2,8,32], index: 0, kind: input, shape index: {}]   ;;  %s1693_s1 = inlined_call_operand.hbm [shape: bf16[1,32,96], index: 1, kind: input, shape index: {}]   ;;  %s1694_s2 = inlined_call_operand.hbm [shape: bf16[32,32], index: 2, kind: input, shape index: {}]   ;;  %s1695_s3 = inlined_call_operand.vmem [shape: f32[1,32], index: 3, kind: input, shape index: {}]   ;;  %s1696_s4 = inlined_call_operand.hbm [shape: f32[2,8,32], index: 4, kind: output, shape index: {}]  }
   0x1   :  { %11 = vsyncpa [#allocation4 + $0x1], 0 }
   0x2   :  { %12 = vsyncpa [#allocation7], 0 }
   0x3   :  { %13 = vsyncpa [#allocation5], 0 }
   0x4   :  { %15 = vsyncpa [#allocation5 + $0x1], 0  ;;  %s1429_s15 = smov 0   ;;  %s1431_s16 = smov 0  }
   0x5   :  { %s1433_s17 = smov 0   ;;  %s1435_s18 = smov 0  }
   0x6   :  { %s1437_s19 = smov 0   ;;  %s1439_s20 = smov 0  }
   0x7 LB: > { %s971_s21 = sadd.s32 4294967295, %s1380_s20   ;;  %s972_s22 = sadd.s32 4294967294, %s1380_s20   ;;  %s1380_s20 = sphi %s1439_s20, %s21_s20   ;;  %s1376_s19 = sphi %s1437_s19, %s1716_s19   ;;  %s1372_s18 = sphi %s1435_s18, %s1715_s18   ;;  %s1368_s17 = sphi %s1433_s17, %s1714_s17   ;;  %s1364_s16 = sphi %s1431_s16, %s1713_s16   ;;  %s1360_s15 = sphi %s1429_s15, %s1712_s15  }
   0x8   : > { %p53_p0 = scmp.ne.s32.totalorder %s1364_s16, %s1360_s15  ;;  %p1463_p1 = scmp.eq.s32.totalorder %s971_s21, 0 }
   0x9   : > { %p1467_p2 = scmp.eq.s32.totalorder %s971_s21, 1  ;;  %p146_p3 = scmp.eq.s32.totalorder %s972_s22, 1 }
   0xa   : > { %s1700_s23 = scalar_select %p1463_p1, 1, 0 }
   0xb   : > { %p1473_p4 = por %p1463_p1, %p53_p0  ;;  %p973_p5 = scmp.ge.s32.totalorder %s1380_s20, 1 }
   0xc   : > { %p1478_p6 = por %p146_p3, %p53_p0  ;;  %p153_p7 = scmp.lt.s32.totalorder %s1380_s20, 3 }
   0xd   : > { %s1702_s25 = scalar_select %p1473_p4, 1, 0 }
   0xe   : > { %s1703_s26 = scalar_select %p1478_p6, 1, 0 }
   0xf   : > { %p1483_p8 = pnand %p973_p5, %p153_p7  ;;  %s1382_s28 = smov [#allocation6]  }
  0x10   : > { %s165_s29 = sshll.u32 %s1382_s28, 4  ;;  %s1383_s5 = smov [#allocation8]   ;;  %s166_s29 = int_to_ptr.vmem [resolvable:$true] %s165_s29 }
  0x11   : > { %p1107_p9 = pneg %p1483_p8  ;;  %s178_s6 = sshll.u32 %s1383_s5, 4  ;;  %s179_s6 = int_to_ptr.vmem [resolvable:$true] %s178_s6 }
  0x12   : > { %s1227_s7 = scalar_lea.vmem %s166_s29, 256  ;;  %p1235_p5 = scmp.lt.s32.totalorder %s166_s29, %s166_s29 }
  0x13   : > { %p1492_p11 = pnand %p1107_p9, %p1463_p1  ;;  %p1228_p13 = scmp.ne.s32.totalorder %s166_s29, %s1227_s7 }
  0x14   : > { %p1236_p7 = scmp.lt.s32.totalorder %s1227_s7, %s1227_s7 }
  0x15   : > { %p1218_p12 = pneg %p1492_p11 }
  0x16   : > { %p1237_p10 = por %p1236_p7, %p1235_p5 }
  0x17   : > { %p1230_p0 = pnand %p1228_p13, %p1218_p12 }
  0x19   : > { %p1231_p3 = pneg %p1230_p0 }
  0x1b   : > { %p1238_p9 = pnand %p1237_p10, %p1231_p3 }
  0x1d   : > { %1241 = shalt.err (!%p1238_p9)
}
  0x1e   : > { %s1384_s8 = smov 64   ;;  %s1385_s9 = smov 4  }
  0x1f   : > { %1110 = dma.hbm_to_vmem [thread:$0]  (!%p1492_p11), %s1693_s1, 256, %s166_s29, [#allocation7], %s1384_s8, %s1384_s8, %s1385_s9  }
  0x20   : > { %s1253_s12 = scalar_lea.vmem %s179_s6, 256  ;;  %p1261_p1 = scmp.lt.s32.totalorder %s179_s6, %s179_s6 }
  0x21   : > { %p1254_p6 = scmp.ne.s32.totalorder %s179_s6, %s1253_s12  ;;  %p1262_p4 = scmp.lt.s32.totalorder %s1253_s12, %s1253_s12 }
  0x23   : > { %p1256_p13 = pnand %p1254_p6, %p1218_p12  ;;  %p1263_p5 = por %p1262_p4, %p1261_p1 }
  0x25   : > { %p1257_p0 = pneg %p1256_p13 }
  0x27   : > { %p1264_p10 = pnand %p1263_p5, %p1257_p0 }
  0x29   : > { %1267 = shalt.err (!%p1264_p10)
}
  0x2a   : > { %1113 = dma.hbm_to_vmem [thread:$0]  (!%p1492_p11), %s1694_s2, 256, %s179_s6, [#allocation7], %s1384_s8, %s1384_s8, %s1385_s9  }
  0x2b   : > { %s33_s21 = sadd.s32 1, %s1376_s19  ;;  %s40_s22 = sadd.s32 1, %s1368_s17 }
  0x2c   : > { %p35_p1 = scmp.ge.s32.totalorder %s33_s21, 2  ;;  %p47_p4 = scmp.ne.s32.totalorder %s1368_s17, %s1364_s16 }
  0x2d   : > { %p48_p6 = scmp.eq.s32.totalorder %s1380_s20, 0  ;;  %p1124_p12 = scmp.lt.s32.totalorder %s1380_s20, 2 }
  0x2e   : > { %s1718_s21 = smov (%p35_p1, %s33_s21), 0  ;;  %p1524_p7 = por %p1467_p2, %p47_p4 }
  0x2f   : > { %p49_p3 = por %p48_p6, %p47_p4  ;;  %s37_s29 = ssub.s32 %s1376_s19, %s1718_s21 }
  0x30   : > { %s195_s30 = sand.u32 1, %s1368_s17   ;;  %p38_p9 = scmp.eq.s32.totalorder %s37_s29, 0 }
  0x31   : > { %s977_s5 = sshll.u32 %s195_s30, 2  ;;  %s978_s6 = sshll.u32 %s1376_s19, 6 }
  0x32   : > { %s1533_s7 = scalar_select %p38_p9, %s1368_s17, %s40_s22  }
  0x33   : > { %s204_s10 = scalar_lea.hbm %s1692_s0, %s978_s6  ;;  %s199_s11 = scalar_lea.vmem [#allocation3], %s977_s5 }
  0x34   : > { %s206_s12 = sshll.u32 %s199_s11, 4  ;;  %p1540_p11 = pnand %p1124_p12, %p49_p3  ;;  %s207_s12 = int_to_ptr.vmem [resolvable:$true] %s206_s12 }
  0x35   : > { %s196_s13 = scalar_lea.sflag [#allocation4], %s195_s30  ;;  %s1281_s14 = scalar_lea.vmem %s207_s12, 64 }
  0x36   : > { %p1270_p2 = pneg %p1540_p11  ;;  %p1282_p13 = scmp.ne.s32.totalorder %s207_s12, %s1281_s14 }
  0x37   : > { %s1386_s22 = smov [#allocation3]  }
  0x38   : > { %p1284_p0 = pnand %p1282_p13, %p1270_p2  ;;  %s1286_s29 = sshll.u32 %s1386_s22, 4  ;;  %s1287_s29 = int_to_ptr.vmem [resolvable:$false] %s1286_s29 }
  0x39   : > { %s1288_s6 = scalar_lea.vmem %s1287_s29, 128  ;;  %p1289_p10 = scmp.lt.s32.totalorder %s207_s12, %s1287_s29 }
  0x3a   : > { %p1285_p5 = pneg %p1284_p0  ;;  %p1290_p1 = scmp.lt.s32.totalorder %s1288_s6, %s1281_s14 }
  0x3c   : > { %p1291_p4 = por %p1290_p1, %p1289_p10 }
  0x3e   : > { %p1292_p6 = pnand %p1291_p4, %p1285_p5 }
  0x40   : > { %1295 = shalt.err (!%p1292_p6)
}
  0x41   : > { %1117 = dma.hbm_to_vmem [thread:$0]  (!%p1540_p11), %s204_s10, 64, %s207_s12, %s196_s13  }
  0x42   : > { %215 = sbr.rel (%p1483_p8) target bundleno = 1337 (0x539), region = 36  ;;  %s1551_s30 = sand.u32 (!%p1483_p8), 1, %s1364_s16  }
  0x43   : > { %s980_s5 = sshll.u32 (!%p1483_p8), %s1551_s30, 2  ;;  %s218_s8 = scalar_lea.sflag (!%p1483_p8), [#allocation4], %s1551_s30 }
  0x44   : > { %s221_s9 = scalar_lea.vmem (!%p1483_p8), [#allocation3], %s980_s5  ;;  %p1708_p12 = scmp.ne.s32.totalorder (!%p1483_p8), %s1702_s25, 0 }
  0x47   : > { %1347 = dma.done.wait (%p1708_p12), %s218_s8, 64  }
  0x48   : > { %1349 = vsyncadd (%p1708_p12), %s218_s8, 4294967232  ;;  %p1709_p3 = scmp.ne.s32.totalorder %s1700_s23, 0 }
  0x4a   : > { %1351 = dma.done.wait (%p1709_p3), [#allocation7], 512  }
  0x4b   : > { %1353 = vsyncadd (%p1709_p3), [#allocation7], 4294966784  ;;  %v1387_v0 = vmov 0.0   ;;  %vm1388_vm0 = vmmov 0   ;;  %v1196_v1 = vld [vmem:[#allocation6 + $0x8] sm:$0xff]   ;;  %v1197_v2 = vld [vmem:[#allocation6] sm:$0xff]  }
  0x4c   : > { %1031 = vmatprep.subr.bf16.mxu0 %v1387_v0  ;;  %1035 = vmatprep.mubr.msk.bf16.mxu0 %vm1388_vm0, %v1387_v0  ;;  %v255_v3 = vld [vmem:[%s221_s9] sm:$0xf]  ;;  %vm272_vm1 = vcmask 261120   ;;  %s1389_s23 = smov 120   ;;  %s1390_s25 = smov 96   ;;  %vm320_vm2 = vcmask 64512  }
  0x4d   : > { %1039 = vmatprep.subr.bf16.mxu1 %v1387_v0  ;;  %1041 = vmatprep.mubr.msk.bf16.mxu1 %vm1388_vm0, %v1387_v0  ;;  %s1391_s27 = smov 80   ;;  %s1392_s10 = smov 88   ;;  %vm382_vm3 = vcmask 1043456   ;;  %vm762_vm4 = vcmask 60416   ;;  %vm770_vm5 = vcmask 126016   ;;  %vm778_vm6 = vcmask 191616  }
  0x4e   : > { %1032 = vmatpush3.bf16.msra.mxu0 %v1196_v1  ;;  %s1393_s11 = smov 72   ;;  %s1394_s12 = smov 112   ;;  %vm786_vm7 = vcmask 257216  }
  0x4f   : > { %1033 = vmatprep.subr.bf16.mxu0 %v1387_v0  ;;  %s1395_s24 = smov 104   ;;  %s1396_s13 = smov 56  }
  0x50   : > { %s1397_s14 = smov 64   ;;  %s1398_s22 = smov 40  }
  0x51   : > { %s1399_s29 = smov 48   ;;  %s1400_s6 = smov 8  }
  0x52   : > { %1034 = vmatpush3.bf16.msra.mxu0 %v1197_v2  ;;  %s1401_s5 = smov 16   ;;  %s1402_s8 = smov 24  }
  0x53   : > { %1045 = vmatprep.subr.bf16.mxu0 %v1387_v0  ;;  %s983_s9 = sshll.u32 %s1551_s30, 3 }
  0x55   : > { %1036 = vmatmul.mubr.msk.bf16.vlgmr.msra.gmra.mxu0 %vm272_vm1, %v255_v3 }
  0x56   : > { %1047 = vmatprep.mubr.msk.bf16.mxu0 %vm1388_vm0, %v1387_v0 }
 0x115   : > { %v310_v4 = vpop.f32.mrf.mxu0 }
 0x116   : > { %v1574_v5 = vpack.c.bf16 %v310_v4, %v310_v4 }
 0x117   : > { %v1037_v6 = vpop.f32.mrf.mxu0 }
 0x118   : > { %429 = vrot.lane.b32.xlu1 %v1574_v5, %s1389_s23  ;;  %318 = vrot.lane.b32.xlu0 %v1574_v5, %s1390_s25 }
 0x119   : > { %v313_v7 = vpop.f32.mrf.mxu0 }
 0x11b   : > { %v1038_v8 = vpop.f32.mrf.mxu0 }
 0x11c   : > { %542 = vrot.lane.b32.xlu1 %v1574_v5, %s1391_s27  ;;  %431 = vrot.lane.b32.xlu0 %v1574_v5, %s1392_s10  ;;  %s1003_s27 = sshll.u32 %s1372_s18, 7  ;;  %s253_s10 = scalar_lea.vmem [#allocation9], %s983_s9 }
 0x120   : > { %653 = vrot.lane.b32.xlu1 %v1574_v5, %s1393_s11  ;;  %540 = vrot.lane.b32.xlu0 %v1574_v5, %s1394_s12  ;;  %s874_s11 = sshll.u32 %s253_s10, 4  ;;  %s1645_s11 = int_to_ptr.vmem [resolvable:$true] %s874_s11 }
 0x121   : > { %s1296_s18 = scalar_lea.vmem %s1645_s11, 128 }
 0x122   : > { %p1297_p8 = scmp.ne.s32.totalorder %s1645_s11, %s1296_s18 }
 0x124   : > { %651 = vrot.lane.b32.xlu0 %v1574_v5, %s1395_s24  ;;  %p1298_p9 = pnand %p1297_p8, %p1524_p7 }
 0x126   : > { %p1299_p11 = pneg %p1298_p9 }
 0x18a   : > { %v319_v9 = vpop.permute.xlu0 %318  ;;  %v430_v12 = vpop.permute.xlu1 %429 }
 0x18b   : > { %v325_v10 = vsel %vm320_vm2, %v319_v9, 0 }
 0x18c   : > { %1040 = vmatpush3.bf16.xpose.msra.mxu1 %v325_v10 }
 0x18d   : > { %1051 = vmatprep.subr.bf16.mxu1 %v1387_v0 }
 0x18e   : > { %v432_v11 = vpop.permute.xlu0 %431  ;;  %v543_v14 = vpop.permute.xlu1 %542 }
 0x18f   : > { %v437_v13 = vsel %vm320_vm2, %v432_v11, 0  ;;  %v548_v15 = vsel %vm320_vm2, %v543_v14, 0 }
 0x192   : > { %v654_v16 = vpop.permute.xlu1 %653  ;;  %v541_v17 = vpop.permute.xlu0 %540 }
 0x193   : > { %1042 = vmatmul.mubr.msk.bf16.vlgmr.msra.gmra.mxu1 %vm320_vm2, %v1574_v5  ;;  %v659_v18 = vsel %vm320_vm2, %v654_v16, 0 }
 0x194   : > { %1052 = vmatpush3.bf16.xpose.msra.mxu1 %v437_v13  ;;  %1053 = vmatprep.mubr.msk.bf16.mxu1 %vm1388_vm0, %v1387_v0 }
 0x195   : > { %1063 = vmatprep.subr.bf16.mxu1 %v1387_v0 }
 0x196   : > { %v652_v19 = vpop.permute.xlu0 %651 }
 0x19b   : > { %1054 = vmatmul.mubr.msk.bf16.vlgmr.msra.gmra.mxu1 %vm320_vm2, %v430_v12 }
 0x19c   : > { %1064 = vmatpush3.bf16.xpose.msra.mxu1 %v548_v15  ;;  %1065 = vmatprep.mubr.msk.bf16.mxu1 %vm1388_vm0, %v1387_v0 }
 0x19d   : > { %1075 = vmatprep.subr.bf16.mxu1 %v1387_v0 }
 0x1a3   : > { %1066 = vmatmul.mubr.msk.bf16.vlgmr.msra.gmra.mxu1 %vm320_vm2, %v541_v17 }
 0x1a4   : > { %1076 = vmatpush3.bf16.xpose.msra.mxu1 %v659_v18  ;;  %1077 = vmatprep.mubr.msk.bf16.mxu1 %vm1388_vm0, %v1387_v0 }
 0x1a5   : > { %1087 = vmatprep.subr.bf16.mxu1 %v1387_v0 }
 0x1ab   : > { %1078 = vmatmul.mubr.msk.bf16.vlgmr.msra.gmra.mxu1 %vm320_vm2, %v652_v19 }
 0x1ac   : > { %1091 = vmatprep.mubr.msk.bf16.mxu1 %vm1388_vm0, %v1387_v0 }
 0x253   : > { %v361_v20 = vpop.f32.mrf.mxu1 }
 0x254   : > { %v367_v21 = vsel %vm320_vm2, %v361_v20, -inf }
 0x255   : > { %368 = vmax.xlane.f32.xlu1 %v367_v21  ;;  %v1043_v22 = vpop.f32.mrf.mxu1 }
 0x257   : > { %v364_v23 = vpop.f32.mrf.mxu1 }
 0x259   : > { %v1044_v24 = vpop.f32.mrf.mxu1 }
 0x25b   : > { %v473_v25 = vpop.f32.mrf.mxu1 }
 0x25c   : > { %v479_v26 = vsel %vm320_vm2, %v473_v25, -inf }
 0x25d   : > { %480 = vmax.xlane.f32.xlu0 %v479_v26  ;;  %v1055_v27 = vpop.f32.mrf.mxu1 }
 0x25f   : > { %v476_v28 = vpop.f32.mrf.mxu1 }
 0x261   : > { %v1056_v29 = vpop.f32.mrf.mxu1 }
 0x263   : > { %v584_v30 = vpop.f32.mrf.mxu1 }
 0x264   : > { %v590_v31 = vsel %vm320_vm2, %v584_v30, -inf }
 0x265   : > { %591 = vmax.xlane.f32.xlu0 %v590_v31  ;;  %v1067_v32 = vpop.f32.mrf.mxu1 }
 0x266   : > { %489 = vrot.lane.b32.xlu1 %v1574_v5, %s1396_s13  ;;  %v1198_v32 = vld [vmem:[#allocation8 + $0x8] sm:$0xff]   ;;  %s1643_s13 = scalar_lea.hbm %s1696_s4, %s1003_s27 }
 0x267   : > { %v587_v33 = vpop.f32.mrf.mxu1  ;;  %1088 = vmatpush3.bf16.msra.mxu1 %v1198_v32 }
 0x268   : > { %1089 = vmatprep.subr.bf16.mxu1 %v1387_v0 }
 0x269   : > { %v1068_v34 = vpop.f32.mrf.mxu1 }
 0x26a   : > { %v1199_v34 = vld [vmem:[#allocation8] sm:$0xff]  }
 0x26b   : > { %v695_v35 = vpop.f32.mrf.mxu1  ;;  %1090 = vmatpush3.bf16.msra.mxu1 %v1199_v34 }
 0x26c   : > { %v701_v39 = vsel %vm320_vm2, %v695_v35, -inf }
 0x26d   : > { %v1079_v36 = vpop.f32.mrf.mxu1 }
 0x26f   : > { %v698_v37 = vpop.f32.mrf.mxu1 }
 0x271   : > { %v1080_v38 = vpop.f32.mrf.mxu1 }
 0x27b   : > { %377 = vrot.lane.b32.xlu0 %v1574_v5, %s1397_s14  ;;  %s861_s14 = scalar_lea.sflag [#allocation5], %s1551_s30 }
 0x27f   : > { %711 = vrot.lane.b32.xlu0 %v1574_v5, %s1398_s22  ;;  %s1403_s22 = smov [#allocation9]  }
 0x28a   : > { %702 = vmax.xlane.f32.xlu1 %v701_v39 }
 0x29b   : > { %600 = vrot.lane.b32.xlu1 %v1574_v5, %s1399_s29  ;;  %s1300_s29 = sshll.u32 %s1403_s22, 4  ;;  %s1301_s29 = int_to_ptr.vmem [resolvable:$false] %s1300_s29 }
 0x29c   : > { %p1303_p2 = scmp.lt.s32.totalorder %s1645_s11, %s1301_s29 }
 0x2de   : > { %v369_v40 = vpop.xlane.xlu1 %368 }
 0x2df   : > { %v370_v41 = vsub.f32 %v361_v20, %v369_v40 }
 0x2e1   : > { %v371_v42 = vmul.f32 1.442695, %v370_v41 }
 0x2e2   : > { %v490_v52 = vpop.permute.xlu1 %489 }
 0x2e3   : > { %1200 = vpow2.f32 %v371_v42  ;;  %v495_v54 = vsel %vm382_vm3, %v490_v52, 0 }
 0x2e6   : > { %v481_v43 = vpop.xlane.xlu0 %480 }
 0x2e7   : > { %v482_v44 = vsub.f32 %v473_v25, %v481_v43 }
 0x2e9   : > { %v483_v45 = vmul.f32 1.442695, %v482_v44 }
 0x2eb   : > { %1202 = vpow2.f32 %v483_v45 }
 0x2ee   : > { %v592_v46 = vpop.xlane.xlu0 %591 }
 0x2ef   : > { %v593_v47 = vsub.f32 %v584_v30, %v592_v46  ;;  %v998_v46 = vld [vmem:[%s1695_s3] ss:$0 sm:$0xff] }
 0x2f0   : > { %v1201_v49 = vpop.eup %1200 }
 0x2f1   : > { %v594_v48 = vmul.f32 1.442695, %v593_v47  ;;  %v376_v53 = vpack.c.bf16 %v1201_v49, %v1201_v49  ;;  %v373_v57 = vsel %vm320_vm2, %v1201_v49, 0.0 }
 0x2f2   : > { %v378_v50 = vpop.permute.xlu0 %377 }
 0x2f3   : > { %1204 = vpow2.f32 %v594_v48  ;;  %v384_v51 = vsel %vm382_vm3, %v378_v50, 0 }
 0x2f4   : > { %1046 = vmatpush3.bf16.msra.mxu0 %v384_v51 }
 0x2f5   : > { %1057 = vmatprep.subr.bf16.mxu0 %v1387_v0 }
 0x2f6   : > { %v712_v3 = vpop.permute.xlu0 %711 }
 0x2f7   : > { %1048 = vmatmul.mubr.msk.bf16.vlgmr.msra.gmra.mxu0 %vm320_vm2, %v376_v53  ;;  %v717_v5 = vsel %vm382_vm3, %v712_v3, 0 }
 0x2f8   : > { %v1203_v55 = vpop.eup %1202  ;;  %1058 = vmatpush3.bf16.msra.mxu0 %v495_v54  ;;  %1059 = vmatprep.mubr.msk.bf16.mxu0 %vm1388_vm0, %v1387_v0 }
 0x2f9   : > { %v485_v56 = vsel %vm320_vm2, %v1203_v55, 0.0  ;;  %1069 = vmatprep.subr.bf16.mxu0 %v1387_v0  ;;  %v488_v58 = vpack.c.bf16 %v1203_v55, %v1203_v55 }
 0x2fa   : > { %486 = vadd.xlane.f32.xlu1 %v485_v56 }
 0x2fe   : > { %374 = vadd.xlane.f32.xlu1 %v373_v57 }
 0x2ff   : > { %1060 = vmatmul.mubr.msk.bf16.vlgmr.msra.gmra.mxu0 %vm320_vm2, %v488_v58 }
 0x300   : > { %v1205_v59 = vpop.eup %1204  ;;  %1071 = vmatprep.mubr.msk.bf16.mxu0 %vm1388_vm0, %v1387_v0 }
 0x301   : > { %v596_v60 = vsel %vm320_vm2, %v1205_v59, 0.0  ;;  %v599_v4 = vpack.c.bf16 %v1205_v59, %v1205_v59 }
 0x302   : > { %597 = vadd.xlane.f32.xlu0 %v596_v60 }
 0x313   : > { %v703_v61 = vpop.xlane.xlu1 %702 }
 0x314   : > { %v704_v62 = vsub.f32 %v695_v35, %v703_v61 }
 0x316   : > { %v705_v63 = vmul.f32 1.442695, %v704_v62 }
 0x317   : > { %v601_v1 = vpop.permute.xlu1 %600 }
 0x318   : > { %1206 = vpow2.f32 %v705_v63  ;;  %v606_v2 = vsel %vm382_vm3, %v601_v1, 0 }
 0x319   : > { %1070 = vmatpush3.bf16.msra.mxu0 %v606_v2 }
 0x31a   : > { %1081 = vmatprep.subr.bf16.mxu0 %v1387_v0 }
 0x31c   : > { %1072 = vmatmul.mubr.msk.bf16.vlgmr.msra.gmra.mxu0 %vm320_vm2, %v599_v4 }
 0x31d   : > { %1082 = vmatpush3.bf16.msra.mxu0 %v717_v5  ;;  %1083 = vmatprep.mubr.msk.bf16.mxu0 %vm1388_vm0, %v1387_v0 }
 0x325   : > { %v1207_v6 = vpop.eup %1206 }
 0x326   : > { %v707_v7 = vsel %vm320_vm2, %v1207_v6, 0.0  ;;  %v710_v8 = vpack.c.bf16 %v1207_v6, %v1207_v6 }
 0x327   : > { %708 = vadd.xlane.f32.xlu0 %v707_v7 }
 0x328   : > { %1084 = vmatmul.mubr.msk.bf16.vlgmr.msra.gmra.mxu0 %vm320_vm2, %v710_v8 }
 0x383   : > { %v487_v9 = vpop.xlane.xlu1 %486 }
 0x387   : > { %v375_v10 = vpop.xlane.xlu1 %374 }
 0x388   : > { %1208 = vrcp.f32 %v375_v10 }
 0x389   : > { %1210 = vrcp.f32 %v487_v9 }
 0x38b   : > { %v598_v25 = vpop.xlane.xlu0 %597 }
 0x38c   : > { %1212 = vrcp.f32 %v598_v25 }
 0x395   : > { %v1209_v11 = vpop.eup %1208 }
 0x396   : > { %v1211_v18 = vpop.eup %1210 }
 0x399   : > { %v1213_v27 = vpop.eup %1212 }
 0x3b0   : > { %v709_v26 = vpop.xlane.xlu0 %708 }
 0x3b1   : > { %1214 = vrcp.f32 %v709_v26 }
 0x3b7   : > { %v420_v12 = vpop.f32.mrf.mxu0 }
 0x3b8   : > { %v427_v13 = vmul.f32 %v1209_v11, %v420_v12 }
 0x3b9   : > { %v1049_v14 = vpop.f32.mrf.mxu0 }
 0x3ba   : > { %v428_v15 = vpack.c.bf16 %v427_v13, %v427_v13 }
 0x3bb   : > { %v423_v16 = vpop.f32.mrf.mxu0 }
 0x3bc   : > { %763 = vst.msk [vmem:[#allocation2] sm:$0xf] %vm762_vm4, %v428_v15 }
 0x3bd   : > { %v1050_v17 = vpop.f32.mrf.mxu0 }
 0x3be   : > { %v1215_v36 = vpop.eup %1214 }
 0x3bf   : > { %v531_v19 = vpop.f32.mrf.mxu0 }
 0x3c0   : > { %v538_v20 = vmul.f32 %v1211_v18, %v531_v19 }
 0x3c1   : > { %v1061_v21 = vpop.f32.mrf.mxu0 }
 0x3c2   : > { %v1006_v22 = vpack.c.bf16 %v538_v20, %v538_v20 }
 0x3c3   : > { %v534_v23 = vpop.f32.mrf.mxu0 }
 0x3c4   : > { %767 = vrot.lane.b32.xlu0 %v1006_v22, %s1400_s6  ;;  %s1302_s6 = scalar_lea.vmem %s1301_s29, 256 }
 0x3c5   : > { %v1062_v24 = vpop.f32.mrf.mxu0  ;;  %p1304_p13 = scmp.lt.s32.totalorder %s1302_s6, %s1296_s18 }
 0x3c7   : > { %p1305_p0 = por %p1304_p13, %p1303_p2 }
 0x3c9   : > { %p1306_p5 = pnand %p1305_p0, %p1299_p11 }
 0x3dc   : > { %v642_v28 = vpop.f32.mrf.mxu0 }
 0x3dd   : > { %v649_v29 = vmul.f32 %v1213_v27, %v642_v28 }
 0x3de   : > { %v1073_v30 = vpop.f32.mrf.mxu0 }
 0x3df   : > { %v1007_v31 = vpack.c.bf16 %v649_v29, %v649_v29 }
 0x3e0   : > { %v645_v33 = vpop.f32.mrf.mxu0 }
 0x3e1   : > { %775 = vrot.lane.b32.xlu1 %v1007_v31, %s1401_s5 }
 0x3e2   : > { %v1074_v35 = vpop.f32.mrf.mxu0 }
 0x3e8   : > { %v753_v37 = vpop.f32.mrf.mxu0 }
 0x3e9   : > { %v760_v38 = vmul.f32 %v1215_v36, %v753_v37 }
 0x3ea   : > { %v1085_v39 = vpop.f32.mrf.mxu0 }
 0x3eb   : > { %v1008_v40 = vpack.c.bf16 %v760_v38, %v760_v38 }
 0x3ec   : > { %v756_v41 = vpop.f32.mrf.mxu0 }
 0x3ed   : > { %783 = vrot.lane.b32.xlu1 %v1008_v40, %s1402_s8 }
 0x3ee   : > { %v1086_v42 = vpop.f32.mrf.mxu0 }
 0x436   : > { %v768_v43 = vpop.permute.xlu0 %767 }
 0x437   : > { %771 = vst.msk [vmem:[#allocation2] sm:$0xf] %vm770_vm5, %v768_v43 }
 0x453   : > { %v776_v44 = vpop.permute.xlu1 %775 }
 0x454   : > { %779 = vst.msk [vmem:[#allocation2] sm:$0xf] %vm778_vm6, %v776_v44 }
 0x45f   : > { %v784_v0 = vpop.permute.xlu1 %783 }
 0x460   : > { %787 = vst.msk [vmem:[#allocation2] sm:$0xf] %vm786_vm7, %v784_v0 }
 0x467   : > { %v792_v45 = vld [vmem:[#allocation2] sm:$0xf] }
 0x468   : > { %1092 = vmatmul.mubr.msk.bf16.vlgmr.msra.gmra.mxu1 %vm272_vm1, %v792_v45 }
 0x528   : > { %v853_v47 = vpop.f32.mrf.mxu1 }
 0x529   : > { %v854_v48 = vadd.f32 %v998_v46, %v853_v47 }
 0x52a   : > { %v1093_v49 = vpop.f32.mrf.mxu1 }
 0x52b   : > { %859 = vst.msk [vmem:[%s253_s10] sm:$0xff] %vm272_vm1, %v854_v48 }
 0x52c   : > { %v856_v50 = vpop.f32.mrf.mxu1 }
 0x52d   : > { %1309 = shalt.err (!%p1306_p5)
}
 0x52e   : > { %s1310_s5 = scalar_lea.hbm %s1643_s13, 128  ;;  %s1314_s9 = scalar_lea.hbm %s1696_s4, 256 }
 0x52f   : > { %p1311_p10 = scmp.ne.s32.totalorder %s1643_s13, %s1310_s5  ;;  %p1315_p6 = scmp.lt.s32.totalorder %s1643_s13, %s1696_s4 }
 0x530   : > { %p1316_p12 = scmp.lt.s32.totalorder %s1314_s9, %s1310_s5 }
 0x531   : > { %p1312_p1 = pnand %p1311_p10, %p1524_p7 }
 0x532   : > { %p1317_p3 = por %p1316_p12, %p1315_p6 }
 0x533   : > { %p1313_p4 = pneg %p1312_p1 }
 0x535   : > { %p1318_p8 = pnand %p1317_p3, %p1313_p4 }
 0x537   : > { %1321 = shalt.err (!%p1318_p8)
}
 0x538   : > { %1105 = dma.vmem_to_hbm [thread:$0]  (%p1524_p7), %s1645_s11, 128, %s1643_s13, %s861_s14   ;;  %v1094_v51 = vpop.f32.mrf.mxu1 }
 0x539 PF: > { %s886_s27 = sand.u32 1, %s1360_s15   ;;  %p1710_p9 = scmp.ne.s32.totalorder %s1703_s26, 0 }
 0x53a   : > { %p1711_p11 = scmp.ge.s32.totalorder %s1380_s20, 2  ;;  %s887_s10 = scalar_lea.sflag [#allocation5], %s886_s27 }
 0x53c   : > { %p1119_p2 = pnand %p1711_p11, %p1710_p9 }
 0x53e   : > { %p1120_p13 = pneg %p1119_p2 }
 0x540   : > { %1355 = dma.done.wait (%p1120_p13), %s887_s10, 128  }
 0x541   : > { %1357 = vsyncadd (%p1120_p13), %s887_s10, 4294967168  ;;  %s21_s20 = sadd.s32 1, %s1380_s20   ;;  %s1712_s15 = smov %s1364_s16 }
 0x542   : > { %p18_p0 = scmp.ge.s32.totalorder %s21_s20, 4   ;;  %s1713_s16 = smov %s1368_s17 }
 0x543   : > { %s1714_s17 = smov %s1533_s7  ;;  %s1715_s18 = smov %s1376_s19 }
 0x544   : > { %s1716_s19 = smov %s1718_s21  ;;  %20 = sbr.rel (!%p18_p0) target bundleno = 7 (0x7), region = 93 }
 0x549   :  { %892 = vsyncpa [#allocation4], 1 }
 0x54a   :  { %894 = vsyncpa [#allocation4 + $0x1], 1 }
 0x54b   :  { %895 = vsyncpa [#allocation7], 1 }
 0x54c   :  { %896 = vsyncpa [#allocation5], 1 }
 0x54d   :  { %898 = vsyncpa [#allocation5 + $0x1], 1 }

</bundles_post_ra>
